<compile_context>
chip_gen: v7x
topology: tpu7x:2x2x1
jax: 0.10.0
libtpu: 0.0.40
codegen_flags: <defaults>
</compile_context>

<pallas_src>
import jax
import jax.numpy as jnp
from jax.experimental import pallas as pl
from jax.experimental.pallas import tpu as pltpu

_LANES = 128


def _round_up(a: int, b: int) -> int:
    return ((a + b - 1) // b) * b


def _make_kernel(block_rows: int, n_steps: int, rows: int, ragged: bool):
    groups = block_rows // 8

    def content_loss_kernel(x_ref, t_ref, part_ref):
        j = pl.program_id(1)

        @pl.when(j == 0)
        def _():
            part_ref[...] = jnp.zeros_like(part_ref)

        xv = x_ref[...]
        tv = t_ref[...]
        if xv.dtype != jnp.float32:  # trace-time guard: no cast emitted for f32
            xv = xv.astype(jnp.float32)
            tv = tv.astype(jnp.float32)
        d = xv - tv
        sq = d * d

        if ragged:  # trace-time: only emitted when some block is partial/empty
            p = pl.program_id(0)
            g = p * n_steps + j                      # logical (unclamped) block
            valid = rows - g * block_rows            # rows valid in this block
            row_ids = jax.lax.broadcasted_iota(jnp.int32, (block_rows, _LANES), 0)
            sq = jnp.where(row_ids < valid, sq, 0.0)  # zero OOB garbage

        # Collapse block_rows -> 8 sublanes with layout-preserving vreg adds and
        # accumulate into the resident (8, 128) output block (tiny VMEM traffic).
        part_ref[...] += sq.reshape(groups, 8, _LANES).sum(axis=0)

    return content_loss_kernel


def content_loss_forward(x, target, *, block_rows=4096, n_parallel=1,
                         small_thresh=1 << 20):
    """ContentLoss.forward: returns (input_passthrough, mse_loss_scalar)."""
    assert x.shape == target.shape and x.dtype == target.dtype

    total = int(x.size)
    if total == 0:
        return x, jnp.float32(float("nan"))

    rem = total % _LANES
    rows = total // _LANES

    # Small / degenerate inputs: XLA's fused subtract-square-reduce is faster
    # than pallas_call launch + grid overhead.
    if total < small_thresh or rows == 0:
        diff = x.astype(jnp.float32) - target.astype(jnp.float32)
        return x, jnp.mean(diff * diff)

    itemsize = jnp.dtype(x.dtype).itemsize
    min_sublane = 8 * max(1, 4 // itemsize)  # f32: 8, bf16: 16, int8/fp8: 32

    # Shrink the block for small inputs so per-slice work stays bounded.
    per_slice_rows = pl.cdiv(rows, n_parallel)
    block_rows = min(block_rows, _round_up(per_slice_rows, min_sublane))
    block_rows = max(min_sublane, _round_up(block_rows, min_sublane))

    n_blocks = pl.cdiv(rows, block_rows)
    n_steps = pl.cdiv(n_blocks, n_parallel)
    # Any partially-filled (or fully-empty, when n_parallel doesn't divide the
    # block count) block needs in-kernel masking.
    ragged = (n_parallel * n_steps * block_rows) != rows

    main = rows * _LANES
    flat_x = x.reshape(-1)
    flat_t = target.reshape(-1)
    tail_sum = jnp.float32(0.0)
    if rem:
        # <128-element lane tail handled in plain JAX (negligible work). The
        # prefix slice below may materialize a copy, but only for totals that
        # are not a multiple of 128.
        tx = flat_x[main:].astype(jnp.float32)
        tt = flat_t[main:].astype(jnp.float32)
        tail_sum = jnp.sum((tx - tt) ** 2)
        flat_x = flat_x[:main]
        flat_t = flat_t[:main]
    x2 = flat_x.reshape(rows, _LANES)   # free reshape of a contiguous array
    t2 = flat_t.reshape(rows, _LANES)

    kernel = _make_kernel(block_rows, n_steps, rows, ragged)

    last_block = n_blocks - 1

    def in_map(p, j):
        # Clamp so fully-empty trailing blocks never index past the array
        # (their contribution is masked to zero inside the kernel anyway).
        return (jnp.minimum(p * n_steps + j, last_block), 0)

    bytes_accessed = 2 * main * itemsize + n_parallel * 8 * _LANES * 4

    partials = pl.pallas_call(
        kernel,
        out_shape=jax.ShapeDtypeStruct((n_parallel * 8, _LANES), jnp.float32),
        grid=(n_parallel, n_steps),
        in_specs=[
            pl.BlockSpec((block_rows, _LANES), in_map),
            pl.BlockSpec((block_rows, _LANES), in_map),
        ],
        out_specs=pl.BlockSpec((8, _LANES), lambda p, j: (p, 0)),
        compiler_params=pltpu.CompilerParams(
            dimension_semantics=("parallel", "arbitrary"),
        ),
        cost_estimate=pl.CostEstimate(
            flops=3 * main, transcendentals=0, bytes_accessed=bytes_accessed),
    )(x2, t2)

    # 1/total computed in Python double precision, then applied as one f32 mul.
    loss = (jnp.sum(partials) + tail_sum) * jnp.float32(1.0 / total)
    # forward() returns the input unchanged; JAX arrays are immutable -> no copy.
    return x, loss


if __name__ == "__main__":
    key = jax.random.PRNGKey(0)
    kx, kt = jax.random.split(key)

    # 1) Small NCHW feature map, forced through the Pallas path.
    N, C, H, W = 2, 4, 16, 16
    x = jax.random.normal(kx, (N, C, H, W), dtype=jnp.float32)
    target = jax.random.normal(kt, (N, C, H, W), dtype=jnp.float32)

    out, loss = content_loss_forward(x, target, small_thresh=0)
    out = jax.block_until_ready(out)
    loss = jax.block_until_ready(loss)
    ref_loss = jnp.mean((x - target) ** 2)
    assert jnp.allclose(loss, ref_loss, rtol=1e-5, atol=1e-6), (loss, ref_loss)
    assert jnp.array_equal(out, x)

    # 2) Same inputs through the default small-input fallback path.
    out2, loss2 = content_loss_forward(x, target)
    loss2 = jax.block_until_ready(loss2)
    assert jnp.allclose(loss2, ref_loss, rtol=1e-5, atol=1e-6), (loss2, ref_loss)
    assert jnp.array_equal(out2, x)

    # 3) Odd, lane-misaligned shape: exercises the in-kernel ragged-row mask,
    #    the clamped index_map with a 2-slice grid, and the plain-JAX lane tail.
    x_odd = jax.random.normal(kx, (1, 3, 37, 53), dtype=jnp.float32)
    t_odd = jax.random.normal(kt, (1, 3, 37, 53), dtype=jnp.float32)
    _, loss_odd = content_loss_forward(x_odd, t_odd, small_thresh=0, n_parallel=2)
    loss_odd = jax.block_until_ready(loss_odd)
    ref_odd = jnp.mean((x_odd - t_odd) ** 2)
    assert jnp.allclose(loss_odd, ref_odd, rtol=1e-5, atol=1e-6), (loss_odd, ref_odd)

    # 4) Multi-step reduction grid (several blocks accumulated into the
    #    resident output block).
    x_big = jax.random.normal(kx, (2, 8, 32, 32), dtype=jnp.float32)
    t_big = jax.random.normal(kt, (2, 8, 32, 32), dtype=jnp.float32)
    _, loss_big = content_loss_forward(x_big, t_big, block_rows=32, small_thresh=0)
    loss_big = jax.block_until_ready(loss_big)
    ref_big = jnp.mean((x_big - t_big) ** 2)
    assert jnp.allclose(loss_big, ref_big, rtol=1e-5, atol=1e-6), (loss_big, ref_big)

    print("KERNEL_OK")
</pallas_src>

<mosaic_0001>
module attributes {stable_mosaic.version = 11 : i64} {
  func.func @content_loss_kernel(%arg0: i32, %arg1: i32, %arg2: memref<16x128xf32, #tpu.memory_space<vmem>>, %arg3: memref<16x128xf32, #tpu.memory_space<vmem>>, %arg4: memref<8x128xf32, #tpu.memory_space<vmem>>) attributes {dimension_semantics = [#tpu.dimension_semantics<parallel>, #tpu.dimension_semantics<arbitrary>], iteration_bounds = array<i64: 1, 1>, scalar_prefetch = 0 : i64, scratch_operands = 0 : i64, tpu.core_type = #tpu.core_type<tc>, window_params = [{transform_indices = @transform_0, window_bounds = array<i64: 16, 128>}, {transform_indices = @transform_1, window_bounds = array<i64: 16, 128>}, {transform_indices = @transform_2, window_bounds = array<i64: 8, 128>}]} {
    %c0_i32 = arith.constant 0 : i32
    %0 = arith.cmpi eq, %arg1, %c0_i32 : i32
    %1 = arith.extui %0 : i1 to i32
    %c0_i32_0 = arith.constant 0 : i32
    %2 = arith.cmpi ne, %1, %c0_i32_0 : i32
    scf.if %2 {
      %cst_8 = arith.constant 0.000000e+00 : f32
      %12 = vector.broadcast %cst_8 : f32 to vector<8x128xf32>
      %c0_9 = arith.constant 0 : index
      %c0_10 = arith.constant 0 : index
      %13 = vector.load %arg4[%c0_9, %c0_10] : memref<8x128xf32, #tpu.memory_space<vmem>>, vector<8x128xf32>
      tpu.vector_store %arg4[%c0_9, %c0_10], %12 {strides = array<i32>} : memref<8x128xf32, #tpu.memory_space<vmem>>, vector<8x128xf32>,
    } else {
    }
    %c0 = arith.constant 0 : index
    %c0_1 = arith.constant 0 : index
    %3 = vector.load %arg2[%c0, %c0_1] : memref<16x128xf32, #tpu.memory_space<vmem>>, vector<16x128xf32>
    %c0_2 = arith.constant 0 : index
    %c0_3 = arith.constant 0 : index
    %4 = vector.load %arg3[%c0_2, %c0_3] : memref<16x128xf32, #tpu.memory_space<vmem>>, vector<16x128xf32>
    %5 = arith.subf %3, %4 : vector<16x128xf32>
    %6 = arith.mulf %5, %5 : vector<16x128xf32>
    %c0_4 = arith.constant 0 : index
    %c0_5 = arith.constant 0 : index
    %7 = vector.load %arg4[%c0_4, %c0_5] : memref<8x128xf32, #tpu.memory_space<vmem>>, vector<8x128xf32>
    %8 = vector.shape_cast %6 : vector<16x128xf32> to vector<2x8x128xf32>
    %cst = arith.constant dense<0.000000e+00> : vector<8x128xf32>
    %9 = vector.multi_reduction <add>, %8, %cst [0] : vector<2x8x128xf32> to vector<8x128xf32>
    %10 = arith.addf %7, %9 : vector<8x128xf32>
    %c0_6 = arith.constant 0 : index
    %c0_7 = arith.constant 0 : index
    %11 = vector.load %arg4[%c0_6, %c0_7] : memref<8x128xf32, #tpu.memory_space<vmem>>, vector<8x128xf32>
    tpu.vector_store %arg4[%c0_6, %c0_7], %10 {strides = array<i32>} : memref<8x128xf32, #tpu.memory_space<vmem>>, vector<8x128xf32>,
    return
  }
  func.func @transform_0(%arg0: i32, %arg1: i32) -> (i32, i32) {
    %c1_i32 = arith.constant 1 : i32
    %0 = arith.muli %arg0, %c1_i32 : i32
    %1 = arith.addi %0, %arg1 : i32
    %c0_i32 = arith.constant 0 : i32
    %2 = arith.minsi %1, %c0_i32 : i32
    %c0_i32_0 = arith.constant 0 : i32
    %c0_i32_1 = arith.constant 0 : i32
    return %2, %c0_i32_0 : i32, i32
  }
  func.func @transform_1(%arg0: i32, %arg1: i32) -> (i32, i32) {
    %c1_i32 = arith.constant 1 : i32
    %0 = arith.muli %arg0, %c1_i32 : i32
    %1 = arith.addi %0, %arg1 : i32
    %c0_i32 = arith.constant 0 : i32
    %2 = arith.minsi %1, %c0_i32 : i32
    %c0_i32_0 = arith.constant 0 : i32
    %c0_i32_1 = arith.constant 0 : i32
    return %2, %c0_i32_0 : i32, i32
  }
  func.func @transform_2(%arg0: i32, %arg1: i32) -> (i32, i32) {
    %c0_i32 = arith.constant 0 : i32
    %c0_i32_0 = arith.constant 0 : i32
    return %arg0, %c0_i32 : i32, i32
  }
}

</mosaic_0001>

<bundles_post_ra>
// kernel: tpu_custom_call.1
= control target key start
LH: loop header
LB: loop body
LE: loop exit
PB: predicated region body
PF: predicated region fallthrough
CT: control target
= control target key end

     0   :  { %7 = vsyncpa [#allocation3], 0  ;;  %s231_s0 = inlined_call_operand.hbm [shape: f32[16,128], index: 0, kind: input, shape index: {}]   ;;  %s232_s1 = inlined_call_operand.hbm [shape: f32[16,128], index: 1, kind: input, shape index: {}]   ;;  %s233_s2 = inlined_call_operand.hbm [shape: f32[8,128], index: 2, kind: output, shape index: {}]  }
   0x1   :  { %8 = vsyncpa [#allocation6], 0 }
   0x2   :  { %9 = vsyncpa [#allocation4], 0  ;;  %s175_s9 = smov [#allocation2]   ;;  %s103_s13 = scalar_lea.hbm %s231_s0, 256 }
   0x3   :  { %s21_s10 = sshll.u32 %s175_s9, 4  ;;  %p104_p0 = scmp.ne.s32.totalorder %s231_s0, %s103_s13  ;;  %s22_s10 = int_to_ptr.vmem [resolvable:$true] %s21_s10 }
   0x4   :  { %p107_p1 = scmp.lt.u32.totalorder %s103_s13, %s231_s0 }
   0x6   :  { %p109_p2 = pnand %p107_p1, %p104_p0 }
   0x8   :  { %112 = shalt.err (!%p109_p2)
}
   0x9   :  { %s113_s18 = scalar_lea.vmem %s22_s10, 256  ;;  %p118_p4 = scmp.lt.s32.totalorder %s22_s10, %s22_s10 }
   0xa   :  { %p114_p3 = scmp.ne.s32.totalorder %s22_s10, %s113_s18  ;;  %p119_p5 = scmp.lt.s32.totalorder %s113_s18, %s113_s18 }
   0xc   :  { %p120_p6 = por %p119_p5, %p118_p4 }
   0xe   :  { %p121_p7 = pnand %p120_p6, %p114_p3 }
  0x10   :  { %124 = shalt.err (!%p121_p7)
}
  0x11   :  { %s176_s19 = smov 128   ;;  %s177_s20 = smov 8  }
  0x12   :  { %27 = dma.hbm_to_vmem [thread:$0]  %s231_s0, 256, %s22_s10, [#allocation3], %s176_s19, %s176_s19, %s177_s20  }
  0x13   :  { %s178_s23 = smov [#allocation5]   ;;  %s125_s27 = scalar_lea.hbm %s232_s1, 256 }
  0x14   :  { %s39_s24 = sshll.u32 %s178_s23, 4  ;;  %p126_p8 = scmp.ne.s32.totalorder %s232_s1, %s125_s27  ;;  %s40_s24 = int_to_ptr.vmem [resolvable:$true] %s39_s24 }
  0x15   :  { %p129_p9 = scmp.lt.u32.totalorder %s125_s27, %s232_s1 }
  0x17   :  { %p131_p10 = pnand %p129_p9, %p126_p8 }
  0x19   :  { %134 = shalt.err (!%p131_p10)
}
  0x1a   :  { %s135_s4 = scalar_lea.vmem %s40_s24, 256  ;;  %p140_p12 = scmp.lt.s32.totalorder %s40_s24, %s40_s24 }
  0x1b   :  { %p136_p11 = scmp.ne.s32.totalorder %s40_s24, %s135_s4  ;;  %p141_p13 = scmp.lt.s32.totalorder %s135_s4, %s135_s4 }
  0x1d   :  { %p142_p0 = por %p141_p13, %p140_p12 }
  0x1f   :  { %p143_p1 = pnand %p142_p0, %p136_p11 }
  0x21   :  { %146 = shalt.err (!%p143_p1)
}
  0x22   :  { %45 = dma.hbm_to_vmem [thread:$0]  %s232_s1, 256, %s40_s24, [#allocation6], %s176_s19, %s176_s19, %s177_s20  }
  0x23   :  { %169 = dma.done.wait [#allocation3], 256  }
  0x24   :  { %170 = vsyncadd [#allocation3], 4294967040 }
  0x25   :  { %171 = dma.done.wait [#allocation6], 256  }
  0x26   :  { %172 = vsyncadd [#allocation6], 4294967040  ;;  %v65_v0 = vld [vmem:[#allocation2] sm:$0xff]  ;;  %v66_v1 = vld [vmem:[#allocation2 + $0x8] sm:$0xff]  ;;  %s179_s6 = smov [#allocation7]  }
  0x27   :  { %v67_v2 = vld [vmem:[#allocation5] sm:$0xff]  ;;  %v68_v3 = vld [vmem:[#allocation5 + $0x8] sm:$0xff]  ;;  %s83_s7 = sshll.u32 %s179_s6, 4  ;;  %s84_s7 = int_to_ptr.vmem [resolvable:$true] %s83_s7 }
  0x28   :  { %v69_v4 = vsub.f32 %v65_v0, %v67_v2  ;;  %v70_v5 = vsub.f32 %v66_v1, %v68_v3  ;;  %s147_s8 = scalar_lea.vmem %s84_s7, 128  ;;  %p152_p3 = scmp.lt.s32.totalorder %s84_s7, %s84_s7 }
  0x29   :  { %p148_p2 = scmp.ne.s32.totalorder %s84_s7, %s147_s8  ;;  %p153_p4 = scmp.lt.s32.totalorder %s147_s8, %s147_s8 }
  0x2a   :  { %v71_v6 = vmul.f32 %v69_v4, %v69_v4  ;;  %v72_v7 = vmul.f32 %v70_v5, %v70_v5 }
  0x2b   :  { %p154_p5 = por %p153_p4, %p152_p3 }
  0x2c   :  { %v74_v8 = vadd.f32 %v72_v7, %v71_v6 }
  0x2d   :  { %p155_p6 = pnand %p154_p5, %p148_p2 }
  0x2e   :  { %76 = vst [vmem:[#allocation7] sm:$0xff] %v74_v8 }
  0x2f   :  { %158 = shalt.err (!%p155_p6)
}
  0x30   :  { %s159_s10 = scalar_lea.hbm %s233_s2, 128 }
  0x31   :  { %p160_p7 = scmp.ne.s32.totalorder %s233_s2, %s159_s10  ;;  %p163_p8 = scmp.lt.u32.totalorder %s159_s10, %s233_s2 }
  0x33   :  { %p165_p9 = pnand %p163_p8, %p160_p7 }
  0x35   :  { %168 = shalt.err (!%p165_p9)
}
  0x36   :  { %86 = dma.vmem_to_hbm [thread:$0]  %s84_s7, 128, %s233_s2, [#allocation4]  }
  0x37   :  { %173 = dma.done.wait [#allocation4], 128  }
  0x38   :  { %174 = vsyncadd [#allocation4], 4294967168 }
  0x39   :  { %90 = vsyncpa [#allocation3], 1 }
  0x3a   :  { %91 = vsyncpa [#allocation6], 1 }
  0x3b   :  { %92 = vsyncpa [#allocation4], 1 }

</bundles_post_ra>
